<compile_context>
chip_gen: v7x
topology: tpu7x:2x2x1
jax: 0.10.0
libtpu: 0.0.40
codegen_flags: <defaults>
</compile_context>

<pallas_src>
import functools

import jax
import jax.numpy as jnp
import numpy as np
from jax.experimental import pallas as pl
from jax.experimental.pallas import tpu as pltpu


# ---------------------------------------------------------------------------
# Pallas kernel: one lane-dense matmul tile + f32 BN affine + ReLU epilogue.
# ---------------------------------------------------------------------------
def _conv_bn_relu_kernel(x_ref, w_ref, scale_ref, bias_ref, o_ref):
    # x_ref:     (1, K, m_tile)     bf16  im2col tile (output positions in lanes)
    # w_ref:     (cout, K)          bf16  raw conv weight, K flattened as (dy,dx,cin)
    # scale_ref: (cout, 1)          f32   gamma / sqrt(running_var + eps)
    # bias_ref:  (cout, 1)          f32   (conv_bias - running_mean) * scale + beta
    # o_ref:     (1, cout, m_tile)  bf16  one lane-dense tile of (B, cout, P_pad)
    acc = jnp.dot(w_ref[...], x_ref[0],
                  preferred_element_type=jnp.float32)        # (cout, m_tile)
    y = acc * scale_ref[...] + bias_ref[...]                  # f32 BN epilogue
    o_ref[0] = jnp.maximum(y, 0.0).astype(o_ref.dtype)        # ReLU


def _round_up(x, m):
    return -(-x // m) * m


# ---------------------------------------------------------------------------
# Per-layer driver: glue (padding, lane-major im2col, BN affine) + kernel.
# ---------------------------------------------------------------------------
def conv_bn_relu_layer(x_nchw, params, stride, eps=1e-5, m_tile_target=1024):
    """x_nchw: (B, Cin, H, W) -> (B, Cout, Ho, Wo), bf16 activations."""
    w, cb, gamma, beta, rmean, rvar = (params[k] for k in
                                       ("weight", "bias", "gamma", "beta",
                                        "running_mean", "running_var"))
    cout, cin, kh, kw = w.shape
    sh, sw = stride
    ph, pw = (kh - 1) // 2, (kw - 1) // 2
    B, C, H, W = x_nchw.shape
    assert C == cin
    ho = (H + 2 * ph - kh) // sh + 1
    wo = (W + 2 * pw - kw) // sw + 1
    P = ho * wo
    K = kh * kw * cin

    # --- glue: lane-major im2col (positions -> lane dim, taps*cin -> sublanes)
    xb = x_nchw.astype(jnp.bfloat16)
    xp = jnp.pad(xb, ((0, 0), (0, 0), (ph, ph), (pw, pw)))
    taps = []
    for dy in range(kh):
        for dx in range(kw):
            taps.append(xp[:, :,
                           dy:dy + sh * (ho - 1) + 1:sh,
                           dx:dx + sw * (wo - 1) + 1:sw])      # (B, cin, ho, wo)
    xcol = jnp.stack(taps, axis=1).reshape(B, K, P)            # K = (dy,dx,cin)

    # --- tiling: non-overlapping, 128-aligned position tiles ------------------
    m_tile = min(m_tile_target, _round_up(P, 128))
    P_pad = _round_up(P, m_tile)
    n_tiles = P_pad // m_tile
    if P_pad != P:
        xcol = jnp.pad(xcol, ((0, 0), (0, 0), (0, P_pad - P)))

    # --- glue: BN (eval mode) affine, applied in the kernel's f32 epilogue ----
    wk = jnp.transpose(w, (0, 2, 3, 1)).reshape(cout, K).astype(jnp.bfloat16)
    scale = (gamma / jnp.sqrt(rvar + eps)).astype(jnp.float32)
    fbias = ((cb - rmean) * scale + beta).astype(jnp.float32)
    scale2 = scale.reshape(cout, 1)
    fbias2 = fbias.reshape(cout, 1)

    out = pl.pallas_call(
        _conv_bn_relu_kernel,
        out_shape=jax.ShapeDtypeStruct((B, cout, P_pad), jnp.bfloat16),
        grid=(B, n_tiles),
        in_specs=[
            pl.BlockSpec((1, K, m_tile), lambda b, i: (b, 0, i)),
            pl.BlockSpec((cout, K), lambda b, i: (0, 0)),
            pl.BlockSpec((cout, 1), lambda b, i: (0, 0)),
            pl.BlockSpec((cout, 1), lambda b, i: (0, 0)),
        ],
        out_specs=pl.BlockSpec((1, cout, m_tile), lambda b, i: (b, 0, i)),
        compiler_params=pltpu.CompilerParams(
            dimension_semantics=("parallel", "parallel")),
    )(xcol, wk, scale2, fbias2)

    return out[:, :, :P].reshape(B, cout, ho, wo)


# ---------------------------------------------------------------------------
# Full module forward (activations carried channel-first NCHW, like PyTorch)
# ---------------------------------------------------------------------------
def output_lengths(in_lengths, strides):
    out = in_lengths
    for s in strides:
        out = (out + s[0] - 1) // s[0]
    return out


def conv_bn_relu_forward(src, src_lengths, layer_params, strides, in_channels):
    """src: (B, T, feat) with feat = in_channels * freq."""
    B, T, feat = src.shape
    freq = feat // in_channels
    # PyTorch: view(B,T,Cin,freq).transpose(1,2) -> (B, Cin, T, freq) NCHW.
    x = src.reshape(B, T, in_channels, freq).transpose(0, 2, 1, 3)
    for params, stride in zip(layer_params, strides):
        x = conv_bn_relu_layer(x, params, stride)
    # (B, C, T', F') -> (B, T', C, F') -> (B, T', C*F')
    B, C, To, Fo = x.shape
    x = x.transpose(0, 2, 1, 3).reshape(B, To, C * Fo).astype(jnp.float32)

    x_lengths = output_lengths(src_lengths, strides)
    padding_mask = jnp.arange(To)[None, :] >= x_lengths[:, None]
    x = jnp.where(padding_mask[..., None], 0.0, x)
    return x, x_lengths, padding_mask


# ---------------------------------------------------------------------------
# Pure-JAX reference (sanity check)
# ---------------------------------------------------------------------------
def _reference_forward(src, src_lengths, layer_params, strides, in_channels,
                       eps=1e-5):
    B, T, feat = src.shape
    freq = feat // in_channels
    x = src.reshape(B, T, in_channels, freq).transpose(0, 2, 1, 3)  # NCHW
    for params, stride in zip(layer_params, strides):
        w = params["weight"]
        kh, kw = w.shape[2], w.shape[3]
        ph, pw = (kh - 1) // 2, (kw - 1) // 2
        y = jax.lax.conv_general_dilated(
            x, w, window_strides=stride, padding=[(ph, ph), (pw, pw)],
            dimension_numbers=("NCHW", "OIHW", "NCHW"))
        y = y + params["bias"][None, :, None, None]
        y = ((y - params["running_mean"][None, :, None, None])
             / jnp.sqrt(params["running_var"][None, :, None, None] + eps)
             * params["gamma"][None, :, None, None]
             + params["beta"][None, :, None, None])
        x = jnp.maximum(y, 0.0)
    B, C, To, Fo = x.shape
    x = x.transpose(0, 2, 1, 3).reshape(B, To, C * Fo)
    x_lengths = output_lengths(src_lengths, strides)
    padding_mask = jnp.arange(To)[None, :] >= x_lengths[:, None]
    x = jnp.where(padding_mask[..., None], 0.0, x)
    return x, x_lengths, padding_mask


# ---------------------------------------------------------------------------
# Main
# ---------------------------------------------------------------------------
if __name__ == "__main__":
    key = jax.random.PRNGKey(0)

    # Module config (small): 2 layers.
    in_channels = 1
    out_channels = (8, 16)
    kernel_sizes = ((3, 3), (3, 3))
    strides = ((2, 2), (2, 1))

    # Deterministic parameter init (shapes from nn.Conv2d / nn.BatchNorm2d).
    layer_params = []
    cin = in_channels
    for i, (cout, (kh, kw)) in enumerate(zip(out_channels, kernel_sizes)):
        kw_key, kb_key, g_key, b_key = jax.random.split(
            jax.random.fold_in(key, i + 1), 4)
        layer_params.append(dict(
            weight=jax.random.normal(kw_key, (cout, cin, kh, kw),
                                     jnp.float32) * 0.1,
            bias=jax.random.normal(kb_key, (cout,), jnp.float32) * 0.05,
            gamma=1.0 + 0.1 * jax.random.normal(g_key, (cout,), jnp.float32),
            beta=0.1 * jax.random.normal(b_key, (cout,), jnp.float32),
            running_mean=jnp.zeros((cout,), jnp.float32),
            running_var=jnp.ones((cout,), jnp.float32),
        ))
        cin = cout

    # Inputs: src (B, T, feat) with feat = in_channels * freq.
    B, T, freq = 2, 16, 16
    src = jax.random.normal(jax.random.fold_in(key, 100),
                            (B, T, in_channels * freq), jnp.float32)
    src_lengths = jnp.array([16, 9], dtype=jnp.int32)

    fwd = jax.jit(functools.partial(conv_bn_relu_forward,
                                    layer_params=layer_params,
                                    strides=strides,
                                    in_channels=in_channels))
    x, x_lengths, padding_mask = fwd(src, src_lengths)
    jax.block_until_ready(x)

    # Sanity check against a pure-JAX reference (loose tol: bf16 MXU path).
    x_ref, len_ref, mask_ref = _reference_forward(
        src, src_lengths, layer_params, strides, in_channels)
    np.testing.assert_allclose(np.asarray(x), np.asarray(x_ref),
                               rtol=5e-2, atol=5e-2)
    assert np.array_equal(np.asarray(x_lengths), np.asarray(len_ref))
    assert np.array_equal(np.asarray(padding_mask), np.asarray(mask_ref))

    print("KERNEL_OK")
</pallas_src>

<mosaic_0001>
module attributes {stable_mosaic.version = 11 : i64} {
  func.func @_conv_bn_relu_kernel(%arg0: i32, %arg1: i32, %arg2: memref<1x9x128xbf16, #tpu.memory_space<vmem>>, %arg3: memref<8x9xbf16, #tpu.memory_space<vmem>>, %arg4: memref<8x1xf32, #tpu.memory_space<vmem>>, %arg5: memref<8x1xf32, #tpu.memory_space<vmem>>, %arg6: memref<1x8x128xbf16, #tpu.memory_space<vmem>>) attributes {dimension_semantics = [#tpu.dimension_semantics<parallel>, #tpu.dimension_semantics<parallel>], iteration_bounds = array<i64: 2, 1>, scalar_prefetch = 0 : i64, scratch_operands = 0 : i64, tpu.core_type = #tpu.core_type<tc>, window_params = [{transform_indices = @transform_0, window_bounds = array<i64: 1, 9, 128>}, {pipeline_mode = #tpu.pipeline_mode<synchronous>, transform_indices = @transform_1, window_bounds = array<i64: 8, 9>}, {pipeline_mode = #tpu.pipeline_mode<synchronous>, transform_indices = @transform_2, window_bounds = array<i64: 8, 1>}, {pipeline_mode = #tpu.pipeline_mode<synchronous>, transform_indices = @transform_3, window_bounds = array<i64: 8, 1>}, {transform_indices = @transform_4, window_bounds = array<i64: 1, 8, 128>}]} {
    %c0 = arith.constant 0 : index
    %c0_0 = arith.constant 0 : index
    %0 = vector.load %arg3[%c0, %c0_0] : memref<8x9xbf16, #tpu.memory_space<vmem>>, vector<8x9xbf16>
    %c0_1 = arith.constant 0 : index
    %c0_2 = arith.constant 0 : index
    %c0_3 = arith.constant 0 : index
    %1 = vector.load %arg2[%c0_1, %c0_2, %c0_3] : memref<1x9x128xbf16, #tpu.memory_space<vmem>>, vector<1x9x128xbf16>
    %2 = vector.shape_cast %1 : vector<1x9x128xbf16> to vector<9x128xbf16>
    %cst = arith.constant dense<0.000000e+00> : vector<8x128xf32>
    %3 = tpu.matmul %0, %2, %cst {dimension_numbers = #tpu.dot_dimension_numbers<[1], [0], [0], [1], [0, 0, 1, 1], [], []>} : vector<8x9xbf16>, vector<9x128xbf16>, vector<8x128xf32> -> vector<8x128xf32>
    %c0_4 = arith.constant 0 : index
    %c0_5 = arith.constant 0 : index
    %4 = vector.load %arg4[%c0_4, %c0_5] : memref<8x1xf32, #tpu.memory_space<vmem>>, vector<8x1xf32>
    %5 = vector.broadcast %4 : vector<8x1xf32> to vector<8x128xf32>
    %6 = arith.mulf %3, %5 : vector<8x128xf32>
    %c0_6 = arith.constant 0 : index
    %c0_7 = arith.constant 0 : index
    %7 = vector.load %arg5[%c0_6, %c0_7] : memref<8x1xf32, #tpu.memory_space<vmem>>, vector<8x1xf32>
    %8 = vector.broadcast %7 : vector<8x1xf32> to vector<8x128xf32>
    %9 = arith.addf %6, %8 : vector<8x128xf32>
    %cst_8 = arith.constant 0.000000e+00 : f32
    %10 = vector.broadcast %cst_8 : f32 to vector<8x128xf32>
    %11 = arith.maximumf %9, %10 : vector<8x128xf32>
    %12 = arith.truncf %11 : vector<8x128xf32> to vector<8x128xbf16>
    %c0_9 = arith.constant 0 : index
    %c0_10 = arith.constant 0 : index
    %c0_11 = arith.constant 0 : index
    %13 = vector.load %arg6[%c0_9, %c0_10, %c0_11] : memref<1x8x128xbf16, #tpu.memory_space<vmem>>, vector<1x8x128xbf16>
    %14 = vector.shape_cast %13 : vector<1x8x128xbf16> to vector<8x128xbf16>
    %15 = vector.shape_cast %12 : vector<8x128xbf16> to vector<1x8x128xbf16>
    tpu.vector_store %arg6[%c0_9, %c0_10, %c0_11], %15 {strides = array<i32>} : memref<1x8x128xbf16, #tpu.memory_space<vmem>>, vector<1x8x128xbf16>,
    return
  }
  func.func @transform_0(%arg0: i32, %arg1: i32) -> (i32, i32, i32) {
    %c0_i32 = arith.constant 0 : i32
    %c0_i32_0 = arith.constant 0 : i32
    return %arg0, %c0_i32, %arg1 : i32, i32, i32
  }
  func.func @transform_1(%arg0: i32, %arg1: i32) -> (i32, i32) {
    %c0_i32 = arith.constant 0 : i32
    %c0_i32_0 = arith.constant 0 : i32
    %c0_i32_1 = arith.constant 0 : i32
    return %c0_i32, %c0_i32_0 : i32, i32
  }
  func.func @transform_2(%arg0: i32, %arg1: i32) -> (i32, i32) {
    %c0_i32 = arith.constant 0 : i32
    %c0_i32_0 = arith.constant 0 : i32
    %c0_i32_1 = arith.constant 0 : i32
    return %c0_i32, %c0_i32_0 : i32, i32
  }
  func.func @transform_3(%arg0: i32, %arg1: i32) -> (i32, i32) {
    %c0_i32 = arith.constant 0 : i32
    %c0_i32_0 = arith.constant 0 : i32
    %c0_i32_1 = arith.constant 0 : i32
    return %c0_i32, %c0_i32_0 : i32, i32
  }
  func.func @transform_4(%arg0: i32, %arg1: i32) -> (i32, i32, i32) {
    %c0_i32 = arith.constant 0 : i32
    %c0_i32_0 = arith.constant 0 : i32
    return %arg0, %c0_i32, %arg1 : i32, i32, i32
  }
}

module attributes {stable_mosaic.version = 11 : i64} {
  func.func @_conv_bn_relu_kernel(%arg0: i32, %arg1: i32, %arg2: memref<1x72x128xbf16, #tpu.memory_space<vmem>>, %arg3: memref<16x72xbf16, #tpu.memory_space<vmem>>, %arg4: memref<16x1xf32, #tpu.memory_space<vmem>>, %arg5: memref<16x1xf32, #tpu.memory_space<vmem>>, %arg6: memref<1x16x128xbf16, #tpu.memory_space<vmem>>) attributes {dimension_semantics = [#tpu.dimension_semantics<parallel>, #tpu.dimension_semantics<parallel>], iteration_bounds = array<i64: 2, 1>, scalar_prefetch = 0 : i64, scratch_operands = 0 : i64, tpu.core_type = #tpu.core_type<tc>, window_params = [{transform_indices = @transform_0, window_bounds = array<i64: 1, 72, 128>}, {pipeline_mode = #tpu.pipeline_mode<synchronous>, transform_indices = @transform_1, window_bounds = array<i64: 16, 72>}, {pipeline_mode = #tpu.pipeline_mode<synchronous>, transform_indices = @transform_2, window_bounds = array<i64: 16, 1>}, {pipeline_mode = #tpu.pipeline_mode<synchronous>, transform_indices = @transform_3, window_bounds = array<i64: 16, 1>}, {transform_indices = @transform_4, window_bounds = array<i64: 1, 16, 128>}]} {
    %c0 = arith.constant 0 : index
    %c0_0 = arith.constant 0 : index
    %0 = vector.load %arg3[%c0, %c0_0] : memref<16x72xbf16, #tpu.memory_space<vmem>>, vector<16x72xbf16>
    %c0_1 = arith.constant 0 : index
    %c0_2 = arith.constant 0 : index
    %c0_3 = arith.constant 0 : index
    %1 = vector.load %arg2[%c0_1, %c0_2, %c0_3] : memref<1x72x128xbf16, #tpu.memory_space<vmem>>, vector<1x72x128xbf16>
    %2 = vector.shape_cast %1 : vector<1x72x128xbf16> to vector<72x128xbf16>
    %cst = arith.constant dense<0.000000e+00> : vector<16x128xf32>
    %3 = tpu.matmul %0, %2, %cst {dimension_numbers = #tpu.dot_dimension_numbers<[1], [0], [0], [1], [0, 0, 1, 1], [], []>} : vector<16x72xbf16>, vector<72x128xbf16>, vector<16x128xf32> -> vector<16x128xf32>
    %c0_4 = arith.constant 0 : index
    %c0_5 = arith.constant 0 : index
    %4 = vector.load %arg4[%c0_4, %c0_5] : memref<16x1xf32, #tpu.memory_space<vmem>>, vector<16x1xf32>
    %5 = vector.broadcast %4 : vector<16x1xf32> to vector<16x128xf32>
    %6 = arith.mulf %3, %5 : vector<16x128xf32>
    %c0_6 = arith.constant 0 : index
    %c0_7 = arith.constant 0 : index
    %7 = vector.load %arg5[%c0_6, %c0_7] : memref<16x1xf32, #tpu.memory_space<vmem>>, vector<16x1xf32>
    %8 = vector.broadcast %7 : vector<16x1xf32> to vector<16x128xf32>
    %9 = arith.addf %6, %8 : vector<16x128xf32>
    %cst_8 = arith.constant 0.000000e+00 : f32
    %10 = vector.broadcast %cst_8 : f32 to vector<16x128xf32>
    %11 = arith.maximumf %9, %10 : vector<16x128xf32>
    %12 = arith.truncf %11 : vector<16x128xf32> to vector<16x128xbf16>
    %c0_9 = arith.constant 0 : index
    %c0_10 = arith.constant 0 : index
    %c0_11 = arith.constant 0 : index
    %13 = vector.load %arg6[%c0_9, %c0_10, %c0_11] : memref<1x16x128xbf16, #tpu.memory_space<vmem>>, vector<1x16x128xbf16>
    %14 = vector.shape_cast %13 : vector<1x16x128xbf16> to vector<16x128xbf16>
    %15 = vector.shape_cast %12 : vector<16x128xbf16> to vector<1x16x128xbf16>
    tpu.vector_store %arg6[%c0_9, %c0_10, %c0_11], %15 {strides = array<i32>} : memref<1x16x128xbf16, #tpu.memory_space<vmem>>, vector<1x16x128xbf16>,
    return
  }
  func.func @transform_0(%arg0: i32, %arg1: i32) -> (i32, i32, i32) {
    %c0_i32 = arith.constant 0 : i32
    %c0_i32_0 = arith.constant 0 : i32
    return %arg0, %c0_i32, %arg1 : i32, i32, i32
  }
  func.func @transform_1(%arg0: i32, %arg1: i32) -> (i32, i32) {
    %c0_i32 = arith.constant 0 : i32
    %c0_i32_0 = arith.constant 0 : i32
    %c0_i32_1 = arith.constant 0 : i32
    return %c0_i32, %c0_i32_0 : i32, i32
  }
  func.func @transform_2(%arg0: i32, %arg1: i32) -> (i32, i32) {
    %c0_i32 = arith.constant 0 : i32
    %c0_i32_0 = arith.constant 0 : i32
    %c0_i32_1 = arith.constant 0 : i32
    return %c0_i32, %c0_i32_0 : i32, i32
  }
  func.func @transform_3(%arg0: i32, %arg1: i32) -> (i32, i32) {
    %c0_i32 = arith.constant 0 : i32
    %c0_i32_0 = arith.constant 0 : i32
    %c0_i32_1 = arith.constant 0 : i32
    return %c0_i32, %c0_i32_0 : i32, i32
  }
  func.func @transform_4(%arg0: i32, %arg1: i32) -> (i32, i32, i32) {
    %c0_i32 = arith.constant 0 : i32
    %c0_i32_0 = arith.constant 0 : i32
    return %arg0, %c0_i32, %arg1 : i32, i32, i32
  }
}

</mosaic_0001>

<bundles_post_ra>
// kernel: conv_bn_relu_forward.2
= control target key start
LH: loop header
LB: loop body
LE: loop exit
PB: predicated region body
PF: predicated region fallthrough
CT: control target
= control target key end

     0   :  { %s485_s15 = smov 0   ;;  %s487_s16 = smov 0   ;;  %s531_s0 = inlined_call_operand.vmem [shape: bf16[2,9,128], index: 0, kind: input, shape index: {}]   ;;  %s532_s1 = inlined_call_operand.vmem [shape: bf16[8,9], index: 1, kind: input, shape index: {}]   ;;  %s533_s2 = inlined_call_operand.vmem [shape: f32[8,1], index: 2, kind: input, shape index: {}]   ;;  %s534_s3 = inlined_call_operand.vmem [shape: f32[8,1], index: 3, kind: input, shape index: {}]   ;;  %s535_s4 = inlined_call_operand.vmem [shape: bf16[2,8,128], index: 4, kind: output, shape index: {}]  }
   0x1   :  { %s489_s17 = smov 0  }
   0x2 LB: > { %s26_s18 = sadd.s32 1, %s450_s16  ;;  %p385_p0 = scmp.ge.s32.totalorder %s454_s17, 1  ;;  %s454_s17 = sphi %s489_s17, %s14_s17   ;;  %s450_s16 = sphi %s487_s16, %s537_s16   ;;  %s446_s15 = sphi %s485_s15, %s536_s15  }
   0x3   : > { %p28_p1 = scmp.ge.s32.totalorder %s26_s18, 2  ;;  %p181_p2 = scmp.lt.s32.totalorder %s454_s17, 3 }
   0x5   : > { %s539_s18 = smov (%p28_p1, %s26_s18), 0  ;;  %p182_p3 = pnand %p385_p0, %p181_p2 }
   0x6   : > { %p212_p4 = scmp.lt.s32.totalorder (!%p182_p3), %s446_s15, 1  ;;  %vm240_vm0 = vcmask (!%p182_p3), 1043456   ;;  %v287_v0 = vld [vmem:[%s533_s2] sm:$0xff] (!%p182_p3)  ;;  %v456_v1 = vmov (!%p182_p3), 0.0   ;;  %vm241_vm1 = vcmask (!%p182_p3), 1044480   ;;  %v457_v2 = vmov (!%p182_p3), 65535  }
   0x7   : > { %185 = sbr.rel (%p182_p3) target bundleno = 244 (0xf4), region = 36  ;;  %396 = vmatprep.subr.bf16.mxu0 (!%p182_p3), %v456_v1  ;;  %v242_v3 = vsel (!%p182_p3), %vm240_vm0, 4294967295, %v457_v2  ;;  %vm458_vm2 = vmmov (!%p182_p3), 0   ;;  %v459_v4 = vmov (!%p182_p3), 0   ;;  %v294_v5 = vld [vmem:[%s534_s3] sm:$0xff] (!%p182_p3)  ;;  %vm236_vm3 = vcmask (!%p182_p3), 72704  }
   0x8   : > { %398 = vmatprep.mubr.msk.bf16.mxu0 (!%p182_p3), %vm458_vm2, %v456_v1  ;;  %430 = vset.pattern.permute.xlu0 (!%p182_p3), %v459_v4  ;;  %v243_v6 = vsel (!%p182_p3), %vm241_vm1, %v242_v3, 0  ;;  %v228_v9 = vld [vmem:[%s532_s1] sm:$0xf] (!%p182_p3) }
   0x9   : > { %290 = vperm.xlu0 (!%p182_p3), %430, %v287_v0  }
   0xd   : > { %297 = vperm.xlu0 (!%p182_p3), %430, %v294_v5  }
   0xe   : > { %s541_s15 = smov (!%p212_p4, %s446_s15), 1 }
   0xf   : > { %s393_s21 = sshll.u32 %s541_s15, 3  ;;  %s388_s29 = sshll.u32 %s541_s15, 2 }
  0x10   : > { %s219_s26 = scalar_lea.vmem %s531_s0, %s393_s21  ;;  %s226_s6 = scalar_lea.vmem %s535_s4, %s388_s29 }
  0x11   : > { %v431_v7 = vld [vmem:[%s219_s26] sm:$0x1f]  }
  0x12   : > { %v245_v8 = vand.u32 %v431_v7, %v243_v6 }
  0x14   : > { %397 = vmatpush3.bf16.msra.mxu0 %v245_v8 }
  0x17   : > { %399 = vmatmul.mubr.msk.bf16.vlgmr.msra.gmra.mrb[0].mxu0 %vm236_vm3, %v228_v9 }
  0x88   : > { %v291_v10 = vpop.permute.xlu0 %290 }
  0x8c   : > { %v298_v14 = vpop.permute.xlu0 %297 }
  0xea   : > { %v281_v11 = vpop.f32.mrb[0].mxu0 }
  0xeb   : > { %v293_v12 = vmul.f32 %v291_v10, %v281_v11  ;;  %v400_v13 = vpop.f32.mrb[1].mxu0 }
  0xec   : > { %v284_v15 = vpop.f32.mrb[2].mxu0 }
  0xed   : > { %v300_v16 = vadd.f32 %v298_v14, %v293_v12  ;;  %v401_v17 = vpop.f32.mrb[3].mxu0 }
  0xef   : > { %v301_v18 = vmax.f32 %v300_v16, 0.0 }
  0xf1   : > { %v302_v19 = vpack.c.bf16 %v301_v18, %v301_v18 }
  0xf3   : > { %303 = vst [vmem:[%s226_s6] sm:$0xf] %v302_v19 }
  0xf4 PF: > { %s14_s17 = sadd.s32 1, %s454_s17   ;;  %s536_s15 = smov %s450_s16 }
  0xf5   : > { %p11_p5 = scmp.ge.s32.totalorder %s14_s17, 4   ;;  %s537_s16 = smov %s539_s18 }
  0xf7   :  { %13 = sbr.rel (!%p11_p5) target bundleno = 2 (0x2), region = 66 }

// kernel: conv_bn_relu_forward.3
= control target key start
LH: loop header
LB: loop body
LE: loop exit
PB: predicated region body
PF: predicated region fallthrough
CT: control target
= control target key end

     0   :  { %s580_s15 = smov 0   ;;  %s582_s16 = smov 0   ;;  %s632_s0 = inlined_call_operand.vmem [shape: bf16[2,72,128], index: 0, kind: input, shape index: {}]   ;;  %s633_s1 = inlined_call_operand.vmem [shape: bf16[16,72], index: 1, kind: input, shape index: {}]   ;;  %s634_s2 = inlined_call_operand.vmem [shape: f32[16,1], index: 2, kind: input, shape index: {}]   ;;  %s635_s3 = inlined_call_operand.vmem [shape: f32[16,1], index: 3, kind: input, shape index: {}]   ;;  %s636_s4 = inlined_call_operand.vmem [shape: bf16[2,16,128], index: 4, kind: output, shape index: {}]  }
   0x1   :  { %s584_s17 = smov 0  }
   0x2 LB: > { %s26_s18 = sadd.s32 1, %s546_s16  ;;  %p449_p0 = scmp.ge.s32.totalorder %s550_s17, 1  ;;  %s550_s17 = sphi %s584_s17, %s14_s17   ;;  %s546_s16 = sphi %s582_s16, %s638_s16   ;;  %s542_s15 = sphi %s580_s15, %s637_s15  }
   0x3   : > { %p28_p1 = scmp.ge.s32.totalorder %s26_s18, 2  ;;  %p181_p2 = scmp.lt.s32.totalorder %s550_s17, 3 }
   0x5   : > { %s640_s18 = smov (%p28_p1, %s26_s18), 0  ;;  %p182_p3 = pnand %p449_p0, %p181_p2 }
   0x6   : > { %p213_p4 = scmp.lt.s32.totalorder (!%p182_p3), %s542_s15, 1  ;;  %v552_v0 = vmov (!%p182_p3), 0.0   ;;  %vm553_vm0 = vmmov (!%p182_p3), 0   ;;  %v322_v1 = vld [vmem:[%s634_s2] sm:$0xff] (!%p182_p3)  ;;  %v554_v2 = vmov (!%p182_p3), 0   ;;  %v323_v4 = vld [vmem:[%s634_s2 + $0x8] sm:$0xff] (!%p182_p3) }
   0x7   : > { %185 = sbr.rel (%p182_p3) target bundleno = 261 (0x105), region = 36  ;;  %478 = vmatprep.subr.bf16.mxu0 (!%p182_p3), %v552_v0  ;;  %488 = vmatprep.mubr.msk.bf16.mxu0 (!%p182_p3), %vm553_vm0, %v552_v0  ;;  %v336_v3 = vld [vmem:[%s635_s3] sm:$0xff] (!%p182_p3)  ;;  %v337_v5 = vld [vmem:[%s635_s3 + $0x8] sm:$0xff] (!%p182_p3)  ;;  %vm277_vm1 = vcmask (!%p182_p3), 1043456   ;;  %vm273_vm2 = vcmask (!%p182_p3), 588800  }
   0x8   : > { %520 = vset.pattern.permute.xlu0 (!%p182_p3), %v554_v2  ;;  %521 = vset.pattern.permute.xlu1 (!%p182_p3), %v554_v2  ;;  %v527_v12 = vld [vmem:[%s633_s1] sm:$0xff] (!%p182_p3)  }
   0x9   : > { %326 = vperm.xlu0 (!%p182_p3), %520, %v322_v1   ;;  %340 = vperm.xlu1 (!%p182_p3), %521, %v336_v3  }
   0xd   : > { %331 = vperm.xlu0 (!%p182_p3), %520, %v323_v4   ;;  %345 = vperm.xlu1 (!%p182_p3), %521, %v337_v5  }
   0xe   : > { %s642_s15 = smov (!%p213_p4, %s542_s15), 1 }
   0xf   : > { %s492_s23 = smul.u32 36, %s642_s15  ;;  %s464_s7 = sshll.u32 %s642_s15, 3 }
  0x10   : > { %s228_s10 = scalar_lea.vmem %s636_s4, %s464_s7 }
  0x11   : > { %s220_s30 = scalar_lea.vmem %s632_s0, %s492_s23 }
  0x12   : > { %v522_v6 = vld [vmem:[%s220_s30] sm:$0xff]   ;;  %v523_v7 = vld [vmem:[%s220_s30 + $0x8] sm:$0xff]   ;;  %v524_v8 = vld [vmem:[%s220_s30 + $0x10] sm:$0xff]  }
  0x13   : > { %479 = vmatpush3.bf16.msra.mxu0 %v522_v6  ;;  %v525_v9 = vld [vmem:[%s220_s30 + $0x18] sm:$0xff]   ;;  %v526_v10 = vld [vmem:[%s220_s30 + $0x20] ss:$0 sps:$4 sm:$0xff]  }
  0x14   : > { %480 = vmatprep.subr.bf16.mxu0 %v552_v0  ;;  %v279_v11 = vsel %vm277_vm1, %v526_v10, 0 }
  0x17   : > { %481 = vmatpush3.bf16.msra.mxu0 %v523_v7 }
  0x18   : > { %482 = vmatprep.subr.bf16.mxu0 %v552_v0 }
  0x1b   : > { %483 = vmatpush3.bf16.msra.mxu0 %v524_v8 }
  0x1c   : > { %484 = vmatprep.subr.bf16.mxu0 %v552_v0 }
  0x1f   : > { %485 = vmatpush3.bf16.msra.mxu0 %v525_v9 }
  0x20   : > { %486 = vmatprep.subr.bf16.mxu0 %v552_v0 }
  0x23   : > { %487 = vmatpush3.bf16.msra.mxu0 %v279_v11 }
  0x26   : > { %489 = vmatmul.mubr.msk.bf16.vlgmr.msra.gmra.mrb[0].mxu0 %vm273_vm2, %v527_v12 }
  0x88   : > { %v327_v13 = vpop.permute.xlu0 %326  ;;  %v341_v14 = vpop.permute.xlu1 %340 }
  0x8c   : > { %v332_v18 = vpop.permute.xlu0 %331  ;;  %v346_v23 = vpop.permute.xlu1 %345 }
  0xf9   : > { %v315_v15 = vpop.f32.mrb[0].mxu0 }
  0xfa   : > { %v334_v16 = vmul.f32 %v327_v13, %v315_v15  ;;  %v490_v17 = vpop.f32.mrb[1].mxu0 }
  0xfb   : > { %v318_v19 = vpop.f32.mrb[2].mxu0 }
  0xfc   : > { %v348_v20 = vadd.f32 %v341_v14, %v334_v16  ;;  %v335_v21 = vmul.f32 %v332_v18, %v318_v19  ;;  %v491_v22 = vpop.f32.mrb[3].mxu0 }
  0xfe   : > { %v349_v24 = vadd.f32 %v346_v23, %v335_v21  ;;  %v350_v25 = vmax.f32 %v348_v20, 0.0 }
 0x100   : > { %v351_v26 = vmax.f32 %v349_v24, 0.0 }
 0x102   : > { %v470_v27 = vpack.c.bf16 %v351_v26, %v350_v25 }
 0x104   : > { %471 = vst [vmem:[%s228_s10] sm:$0xff] %v470_v27  }
 0x105 PF: > { %s14_s17 = sadd.s32 1, %s550_s17   ;;  %s637_s15 = smov %s546_s16 }
 0x106   : > { %p11_p5 = scmp.ge.s32.totalorder %s14_s17, 4   ;;  %s638_s16 = smov %s640_s18 }
 0x108   :  { %13 = sbr.rel (!%p11_p5) target bundleno = 2 (0x2), region = 66 }

</bundles_post_ra>
